<compile_context>
chip_gen: v5e
topology: v5e:2x2
jax: 0.10.0
libtpu: 0.0.40
codegen_flags: <defaults>
</compile_context>

<pallas_src>
import functools

import numpy as np
import jax
import jax.numpy as jnp
from jax import lax
from jax.experimental import pallas as pl
from jax.experimental.pallas import tpu as pltpu


def _round_up(x, m):
    return ((x + m - 1) // m) * m


def _stats_kernel(D, tile_m, tile_n,
                  chunk_start_ref, num_chunks_ref,     # scalar prefetch (SMEM)
                  ids_ref, r_ref, invb_ref,            # inputs
                  o_ref,                               # output
                  acc_ref):                            # VMEM scratch
    """One (voxel-row tile i, point-chunk k) grid step.

    ids_ref : (1, TN)   int32  sorted pooled-voxel id per point (-1 = padding)
    r_ref   : (TN, W)   bf16/f32 packed RHS [1 | x' | x'^2 | 0], x' = coord - voxel origin
    invb_ref: (TM, 1)   f32    1 / (total input points in this voxel's batch)
    o_ref   : (TM, 128) f32    lane-dense output [density | var(D) | norm_center(D) | 0]
    acc_ref : (TM, W)   f32    accumulator, resident across the chunk (k) axis
    """
    i = pl.program_id(0)
    k = pl.program_id(1)

    @pl.when(k == 0)
    def _init():
        acc_ref[...] = jnp.zeros_like(acc_ref)

    # Ragged tiles: only num_chunks[i] chunks carry this tile's points; the
    # index_map clamps so skipped steps re-use the already-resident block.
    @pl.when(k < num_chunks_ref[i])
    def _accumulate():
        # On-device one-hot segment matrix: A[r, j] = 1 iff sorted point j
        # belongs to voxel row i*tile_m + r.  Replaces the HBM-streamed A.
        row_ids = i * tile_m + lax.broadcasted_iota(jnp.int32, (tile_m, tile_n), 0)
        a = (ids_ref[...] == row_ids).astype(r_ref.dtype)
        acc_ref[...] += jnp.dot(a, r_ref[...], preferred_element_type=jnp.float32)

    @pl.when(k == pl.num_programs(1) - 1)
    def _finalize():
        acc = acc_ref[...]
        count = acc[:, 0:1]
        sum_c = acc[:, 1:1 + D]
        sum_c2 = acc[:, 1 + D:1 + 2 * D]

        # Guard only affects zero-count padding rows (sliced off by wrapper).
        count_safe = jnp.where(count > 0, count, 1.0)
        inv_count = pl.reciprocal(count_safe)   # exact; finalize is off the hot loop

        # Coordinates are pre-centered on the voxel origin: mean IS norm_center.
        norm_center = sum_c * inv_count
        var = jnp.maximum(sum_c2 * inv_count - norm_center * norm_center, 0.0)

        # density = sum_pool(1) / broadcast(glob_sum_pool(1))
        density = count * invb_ref[...]

        pad = jnp.zeros((acc.shape[0], o_ref.shape[1] - (1 + 2 * D)), jnp.float32)
        o_ref[...] = jnp.concatenate([density, var, norm_center, pad], axis=-1)


def stats_forward(coords, stride, num_batches, *, tile_m_cap=512, tile_n_cap=2048):
    """coords: (N, 1+D) int array [batch, spatial...].
    Returns ((M, 2*D+1) float32 features, (M, 1+D) pooled coordinates)."""
    coords_np = np.asarray(coords)
    N, D1 = coords_np.shape
    D = D1 - 1

    # ---- coordinate-manager glue (host side, like ME's CPU coordinate map) ----
    sp = coords_np[:, 1:]
    pooled_sp = (sp // stride) * stride                       # per-point voxel origin
    pooled_full = np.concatenate([coords_np[:, :1], pooled_sp], axis=1)
    uniq, inv = np.unique(pooled_full, axis=0, return_inverse=True)
    inv = np.asarray(inv).reshape(-1).astype(np.int64)
    M = uniq.shape[0]

    centered = (sp - pooled_sp).astype(np.float32)            # x' in [0, stride)

    # Sorted-segment layout: group points by pooled-voxel id.
    order = np.argsort(inv, kind="stable")
    inv_s = inv[order].astype(np.int32)
    centered_s = centered[order]

    rhs_w = _round_up(1 + 2 * D, 8)                 # packed RHS / accumulator width
    out_w = _round_up(2 * D + 1, 128)               # lane-dense output width

    # bf16 is exact only while x'^2 <= 256 (stride <= 17); otherwise use f32.
    op_dtype = jnp.bfloat16 if (stride - 1) ** 2 <= 256 else jnp.float32

    # >= 2 M tiles so the "parallel" axis spans both v7x TensorCores; round to
    # the bf16 sublane tile (16).  Chunk (reduction) tile is lane-aligned (128).
    tile_m = int(min(tile_m_cap, max(16, _round_up(-(-M // 2), 16))))
    tile_n = int(min(tile_n_cap, _round_up(max(N, 128), 128)))
    num_m_tiles = -(-M // tile_m)
    M_pad = num_m_tiles * tile_m
    num_chunks_total = -(-N // tile_n)
    N_pad = num_chunks_total * tile_n

    # Per-M-tile contiguous run of sorted points -> point-chunk window.
    tile_lo = np.arange(num_m_tiles, dtype=np.int64) * tile_m
    p_start = np.searchsorted(inv_s, tile_lo, side="left")
    p_end = np.searchsorted(inv_s, tile_lo + tile_m, side="left")
    chunk_start = (p_start // tile_n).astype(np.int32)
    chunk_end = np.ceil(p_end / tile_n).astype(np.int64)
    num_chunks = np.maximum(chunk_end - chunk_start, 1).astype(np.int32)
    max_chunks = int(num_chunks.max())

    # Sorted voxel id per point; padding rows get -1 (matches no output row).
    ids = np.full((1, N_pad), -1, np.int32)
    ids[0, :N] = inv_s

    # Packed RHS [1 | x' | x'^2 | 0-pad]; padding rows all-zero.
    R = np.zeros((N_pad, rhs_w), np.float32)
    R[:N, 0] = 1.0
    R[:N, 1:1 + D] = centered_s
    R[:N, 1 + D:1 + 2 * D] = centered_s * centered_s

    # Per-voxel 1 / (total points in its batch) == ME broadcast(glob_sum_pool(1)).
    batch_ids = coords_np[:, 0].astype(np.int64)
    per_batch = np.bincount(batch_ids, minlength=int(num_batches)).astype(np.float32)
    invb = np.zeros((M_pad, 1), np.float32)
    invb[:M, 0] = 1.0 / per_batch[uniq[:, 0].astype(np.int64)]

    grid = (num_m_tiles, max_chunks)

    # VMEM budget from actual buffer sizes (generation-aware: stays far under
    # v7x's 64 MiB per-TC VMEM; v5e/v6e have headroom to spare).
    itemsize = 2 if op_dtype == jnp.bfloat16 else 4
    vmem_bytes = (
        2 * tile_n * 4                        # ids, double-buffered
        + 2 * tile_n * rhs_w * itemsize       # R, double-buffered
        + 2 * tile_m * 4                      # invb
        + 2 * tile_m * out_w * 4              # output slab
        + tile_m * rhs_w * 4                  # accumulator scratch
        + tile_m * tile_n * (itemsize + 4)    # on-device one-hot / iota temps
    )
    vmem_limit = int(min(40 * 1024 * 1024, max(16 * 1024 * 1024, 2 * vmem_bytes)))

    kernel = functools.partial(_stats_kernel, D, tile_m, tile_n)

    out = pl.pallas_call(
        kernel,
        out_shape=jax.ShapeDtypeStruct((M_pad, out_w), jnp.float32),
        grid_spec=pltpu.PrefetchScalarGridSpec(
            num_scalar_prefetch=2,
            grid=grid,
            in_specs=[
                # sorted voxel ids for chunk cs[i] + min(k, nc[i]-1) (clamped:
                # skipped steps re-use the resident block, no redundant DMA)
                pl.BlockSpec((1, tile_n),
                             lambda i, k, cs, nc: (0, cs[i] + jnp.minimum(k, nc[i] - 1))),
                # packed per-point RHS for the same chunk
                pl.BlockSpec((tile_n, rhs_w),
                             lambda i, k, cs, nc: (cs[i] + jnp.minimum(k, nc[i] - 1), 0)),
                # per-row 1/batch_total, resident across the chunk axis
                pl.BlockSpec((tile_m, 1), lambda i, k, cs, nc: (i, 0)),
            ],
            out_specs=pl.BlockSpec((tile_m, out_w), lambda i, k, cs, nc: (i, 0)),
            scratch_shapes=[pltpu.VMEM((tile_m, rhs_w), jnp.float32)],
        ),
        compiler_params=pltpu.CompilerParams(
            dimension_semantics=("parallel", "arbitrary"),
            vmem_limit_bytes=vmem_limit,
        ),
    )(
        jnp.asarray(chunk_start),
        jnp.asarray(num_chunks),
        jnp.asarray(ids),
        jnp.asarray(R, dtype=op_dtype),
        jnp.asarray(invb),
    )

    return out[:M, :2 * D + 1], uniq


if __name__ == "__main__":
    key = jax.random.PRNGKey(0)
    N, D, C = 64, 3, 4
    kernel_size = 2
    stride = 2        # non-overlapping pooling (kernel_size == stride, dilation=1)
    dilation = 1
    num_batches = 2

    k_sp, k_feat = jax.random.split(key)
    spatial = jax.random.randint(k_sp, (N, D), 0, 16, dtype=jnp.int32)
    batch = jnp.concatenate(
        [jnp.zeros((N // 2, 1), jnp.int32), jnp.ones((N - N // 2, 1), jnp.int32)],
        axis=0,
    )
    coords = jnp.concatenate([batch, spatial], axis=1)            # (N, 1+D)
    x_features = jax.random.normal(k_feat, (N, C), jnp.float32)   # unused by Stats.forward

    feats, pooled_coords = stats_forward(coords, stride, num_batches)
    feats = jax.block_until_ready(feats)

    # ---- pure numpy reference for verification ----
    cnp = np.asarray(coords)
    sp = cnp[:, 1:].astype(np.float32)
    pooled = (cnp[:, 1:] // stride) * stride
    full = np.concatenate([cnp[:, :1], pooled], axis=1)
    uniq, inv = np.unique(full, axis=0, return_inverse=True)
    inv = np.asarray(inv).reshape(-1)
    M = uniq.shape[0]
    ref = np.zeros((M, 2 * D + 1), np.float32)
    for m in range(M):
        idx = np.where(inv == m)[0]
        pts = sp[idx]
        cnt = np.float32(len(idx))
        btot = np.float32(np.sum(cnp[:, 0] == uniq[m, 0]))
        center = pts.sum(axis=0) / cnt
        var = ((pts - center) ** 2).sum(axis=0) / cnt
        ref[m, 0] = cnt / btot
        ref[m, 1:1 + D] = var
        ref[m, 1 + D:] = center - uniq[m, 1:].astype(np.float32)

    assert feats.shape == (M, 2 * D + 1)
    assert np.allclose(np.asarray(feats), ref, atol=1e-4), "Pallas kernel mismatch vs reference"

    print("KERNEL_OK")
</pallas_src>

<mosaic_0001>
module attributes {stable_mosaic.version = 11 : i64} {
  func.func @_stats_kernel(%arg0: i32, %arg1: i32, %arg2: memref<2xi32, #tpu.memory_space<smem>>, %arg3: memref<2xi32, #tpu.memory_space<smem>>, %arg4: memref<1x128xi32, #tpu.memory_space<vmem>>, %arg5: memref<128x8xbf16, #tpu.memory_space<vmem>>, %arg6: memref<32x1xf32, #tpu.memory_space<vmem>>, %arg7: memref<32x128xf32, #tpu.memory_space<vmem>>, %arg8: memref<32x8xf32, #tpu.memory_space<vmem>>) attributes {dimension_semantics = [#tpu.dimension_semantics<parallel>, #tpu.dimension_semantics<arbitrary>], iteration_bounds = array<i64: 2, 1>, scalar_prefetch = 2 : i64, scratch_operands = 1 : i64, tpu.core_type = #tpu.core_type<tc>, window_params = [{transform_indices = @transform_0, window_bounds = array<i64: 1, 128>}, {transform_indices = @transform_1, window_bounds = array<i64: 128, 8>}, {transform_indices = @transform_2, window_bounds = array<i64: 32, 1>}, {transform_indices = @transform_3, window_bounds = array<i64: 32, 128>}]} {
    %c0_i32 = arith.constant 0 : i32
    %0 = arith.cmpi eq, %arg1, %c0_i32 : i32
    %1 = arith.extui %0 : i1 to i32
    %c0_i32_0 = arith.constant 0 : i32
    %2 = arith.cmpi ne, %1, %c0_i32_0 : i32
    scf.if %2 {
      %cst = arith.constant 0.000000e+00 : f32
      %11 = vector.broadcast %cst : f32 to vector<32x8xf32>
      %c0 = arith.constant 0 : index
      %c0_4 = arith.constant 0 : index
      %12 = vector.load %arg8[%c0, %c0_4] : memref<32x8xf32, #tpu.memory_space<vmem>>, vector<32x8xf32>
      tpu.vector_store %arg8[%c0, %c0_4], %11 {strides = array<i32>} : memref<32x8xf32, #tpu.memory_space<vmem>>, vector<32x8xf32>,
    } else {
    }
    %3 = arith.index_cast %arg0 : i32 to index
    %4 = memref.load %arg3[%3] : memref<2xi32, #tpu.memory_space<smem>>
    %5 = arith.cmpi slt, %arg1, %4 : i32
    %6 = arith.extui %5 : i1 to i32
    %c0_i32_1 = arith.constant 0 : i32
    %7 = arith.cmpi ne, %6, %c0_i32_1 : i32
    scf.if %7 {
      %c32_i32 = arith.constant 32 : i32
      %11 = arith.muli %arg0, %c32_i32 : i32
      %12 = tpu.iota {dimensions = array<i32: 0>} : vector<32x128xi32>
      %13 = vector.broadcast %11 : i32 to vector<32x128xi32>
      %14 = arith.addi %13, %12 : vector<32x128xi32>
      %c0 = arith.constant 0 : index
      %c0_4 = arith.constant 0 : index
      %15 = vector.load %arg4[%c0, %c0_4] : memref<1x128xi32, #tpu.memory_space<vmem>>, vector<1x128xi32>
      %16 = vector.broadcast %15 : vector<1x128xi32> to vector<32x128xi32>
      %17 = arith.cmpi eq, %16, %14 : vector<32x128xi32>
      %18 = arith.extui %17 : vector<32x128xi1> to vector<32x128xi32>
      %19 = arith.sitofp %18 : vector<32x128xi32> to vector<32x128xf32>
      %20 = arith.truncf %19 : vector<32x128xf32> to vector<32x128xbf16>
      %c0_5 = arith.constant 0 : index
      %c0_6 = arith.constant 0 : index
      %21 = vector.load %arg8[%c0_5, %c0_6] : memref<32x8xf32, #tpu.memory_space<vmem>>, vector<32x8xf32>
      %c0_7 = arith.constant 0 : index
      %c0_8 = arith.constant 0 : index
      %22 = vector.load %arg5[%c0_7, %c0_8] : memref<128x8xbf16, #tpu.memory_space<vmem>>, vector<128x8xbf16>
      %cst = arith.constant dense<0.000000e+00> : vector<32x8xf32>
      %23 = tpu.matmul %20, %22, %cst {dimension_numbers = #tpu.dot_dimension_numbers<[1], [0], [0], [1], [0, 0, 1, 1], [], []>} : vector<32x128xbf16>, vector<128x8xbf16>, vector<32x8xf32> -> vector<32x8xf32>
      %24 = arith.addf %21, %23 : vector<32x8xf32>
      %c0_9 = arith.constant 0 : index
      %c0_10 = arith.constant 0 : index
      %25 = vector.load %arg8[%c0_9, %c0_10] : memref<32x8xf32, #tpu.memory_space<vmem>>, vector<32x8xf32>
      tpu.vector_store %arg8[%c0_9, %c0_10], %24 {strides = array<i32>} : memref<32x8xf32, #tpu.memory_space<vmem>>, vector<32x8xf32>,
    } else {
    }
    %c0_i32_2 = arith.constant 0 : i32
    %8 = arith.cmpi eq, %arg1, %c0_i32_2 : i32
    %9 = arith.extui %8 : i1 to i32
    %c0_i32_3 = arith.constant 0 : i32
    %10 = arith.cmpi ne, %9, %c0_i32_3 : i32
    scf.if %10 {
      %c0 = arith.constant 0 : index
      %c0_4 = arith.constant 0 : index
      %11 = vector.load %arg8[%c0, %c0_4] : memref<32x8xf32, #tpu.memory_space<vmem>>, vector<32x8xf32>
      %12 = vector.extract_strided_slice %11 {offsets = [0, 0], sizes = [32, 1], strides = [1, 1]} : vector<32x8xf32> to vector<32x1xf32>
      %13 = vector.extract_strided_slice %11 {offsets = [0, 1], sizes = [32, 3], strides = [1, 1]} : vector<32x8xf32> to vector<32x3xf32>
      %14 = vector.extract_strided_slice %11 {offsets = [0, 4], sizes = [32, 3], strides = [1, 1]} : vector<32x8xf32> to vector<32x3xf32>
      %cst = arith.constant 0.000000e+00 : f32
      %15 = vector.broadcast %cst : f32 to vector<32x1xf32>
      %16 = arith.cmpf ogt, %12, %15 : vector<32x1xf32>
      %cst_5 = arith.constant 1.000000e+00 : f32
      %17 = vector.broadcast %cst_5 : f32 to vector<32x1xf32>
      %18 = arith.select %16, %12, %17 : vector<32x1xi1>, vector<32x1xf32>
      %19 = tpu.reciprocal %18 : vector<32x1xf32> -> vector<32x1xf32>
      %20 = vector.broadcast %19 : vector<32x1xf32> to vector<32x3xf32>
      %21 = arith.mulf %13, %20 : vector<32x3xf32>
      %22 = vector.broadcast %19 : vector<32x1xf32> to vector<32x3xf32>
      %23 = arith.mulf %14, %22 : vector<32x3xf32>
      %24 = arith.mulf %21, %21 : vector<32x3xf32>
      %25 = arith.subf %23, %24 : vector<32x3xf32>
      %cst_6 = arith.constant 0.000000e+00 : f32
      %26 = vector.broadcast %cst_6 : f32 to vector<32x3xf32>
      %27 = arith.maximumf %25, %26 : vector<32x3xf32>
      %c0_7 = arith.constant 0 : index
      %c0_8 = arith.constant 0 : index
      %28 = vector.load %arg6[%c0_7, %c0_8] : memref<32x1xf32, #tpu.memory_space<vmem>>, vector<32x1xf32>
      %29 = arith.mulf %12, %28 : vector<32x1xf32>
      %cst_9 = arith.constant 0.000000e+00 : f32
      %30 = vector.broadcast %cst_9 : f32 to vector<32x121xf32>
      %31 = tpu.concatenate %29, %27, %21, %30 in 1 : vector<32x1xf32>, vector<32x3xf32>, vector<32x3xf32>, vector<32x121xf32> -> vector<32x128xf32>
      %c0_10 = arith.constant 0 : index
      %c0_11 = arith.constant 0 : index
      %32 = vector.load %arg7[%c0_10, %c0_11] : memref<32x128xf32, #tpu.memory_space<vmem>>, vector<32x128xf32>
      tpu.vector_store %arg7[%c0_10, %c0_11], %31 {strides = array<i32>} : memref<32x128xf32, #tpu.memory_space<vmem>>, vector<32x128xf32>,
    } else {
    }
    return
  }
  func.func @transform_0(%arg0: i32, %arg1: i32, %arg2: memref<2xi32, #tpu.memory_space<smem>>, %arg3: memref<2xi32, #tpu.memory_space<smem>>) -> (i32, i32) {
    %0 = arith.index_cast %arg0 : i32 to index
    %1 = memref.load %arg2[%0] : memref<2xi32, #tpu.memory_space<smem>>
    %2 = arith.index_cast %arg0 : i32 to index
    %3 = memref.load %arg3[%2] : memref<2xi32, #tpu.memory_space<smem>>
    %c1_i32 = arith.constant 1 : i32
    %4 = arith.subi %3, %c1_i32 : i32
    %5 = arith.minsi %arg1, %4 : i32
    %6 = arith.addi %1, %5 : i32
    %c0_i32 = arith.constant 0 : i32
    %c0_i32_0 = arith.constant 0 : i32
    return %c0_i32, %6 : i32, i32
  }
  func.func @transform_1(%arg0: i32, %arg1: i32, %arg2: memref<2xi32, #tpu.memory_space<smem>>, %arg3: memref<2xi32, #tpu.memory_space<smem>>) -> (i32, i32) {
    %0 = arith.index_cast %arg0 : i32 to index
    %1 = memref.load %arg2[%0] : memref<2xi32, #tpu.memory_space<smem>>
    %2 = arith.index_cast %arg0 : i32 to index
    %3 = memref.load %arg3[%2] : memref<2xi32, #tpu.memory_space<smem>>
    %c1_i32 = arith.constant 1 : i32
    %4 = arith.subi %3, %c1_i32 : i32
    %5 = arith.minsi %arg1, %4 : i32
    %6 = arith.addi %1, %5 : i32
    %c0_i32 = arith.constant 0 : i32
    %c0_i32_0 = arith.constant 0 : i32
    return %6, %c0_i32 : i32, i32
  }
  func.func @transform_2(%arg0: i32, %arg1: i32, %arg2: memref<2xi32, #tpu.memory_space<smem>>, %arg3: memref<2xi32, #tpu.memory_space<smem>>) -> (i32, i32) {
    %c0_i32 = arith.constant 0 : i32
    %c0_i32_0 = arith.constant 0 : i32
    return %arg0, %c0_i32 : i32, i32
  }
  func.func @transform_3(%arg0: i32, %arg1: i32, %arg2: memref<2xi32, #tpu.memory_space<smem>>, %arg3: memref<2xi32, #tpu.memory_space<smem>>) -> (i32, i32) {
    %c0_i32 = arith.constant 0 : i32
    %c0_i32_0 = arith.constant 0 : i32
    return %arg0, %c0_i32 : i32, i32
  }
}

</mosaic_0001>

<bundles_post_ra>
// kernel: tpu_custom_call.1
= control target key start
LH: loop header
LB: loop body
LE: loop exit
PB: predicated region body
PF: predicated region fallthrough
CT: control target
= control target key end

     0   :  { %s1013_s24 = smov [#allocation4]   ;;  %s1014_s25 = smov [#allocation5]   ;;  %s1281_s0 = inlined_call_operand.vmem [shape: s32[2], index: 0, kind: input, shape index: {}]   ;;  %s1282_s2 = inlined_call_operand.vmem [shape: s32[1,128], index: 2, kind: input, shape index: {}]   ;;  %s1283_s3 = inlined_call_operand.vmem [shape: bf16[128,8], index: 3, kind: input, shape index: {}]   ;;  %s1284_s4 = inlined_call_operand.vmem [shape: f32[64,1], index: 4, kind: input, shape index: {}]   ;;  %s1285_s5 = inlined_call_operand.hbm [shape: f32[64,128], index: 5, kind: output, shape index: {}]   ;;  %s1286_s1 = inlined_call_operand.vmem [shape: s32[2], index: 1, kind: input, shape index: {}]  }
   0x1   :  { %s11_s20 = sshll.u32 %s1281_s0, 4  ;;  %s16_s23 = sshll.u32 %s1286_s1, 4  ;;  %s12_s20 = int_to_ptr.vmem [resolvable:$true] %s11_s20  ;;  %s17_s23 = int_to_ptr.vmem [resolvable:$true] %s16_s23 }
   0x2   :  { %14 = dma.vmem_to_smem %s12_s20, 16, %s1013_s24, [#allocation3] }
   0x3   :  { %19 = dma.vmem_to_smem %s17_s23, 16, %s1014_s25, [#allocation3] }
   0x4   :  { %983 = dma.done.wait [#allocation3], 32 }
   0x5   :  { %984 = vsyncadd [#allocation3], 4294967264 }
   0x6   :  { %22 = sfence }
   0x7   :  { %23 = vsyncpa [#allocation7], 0 }
   0x8   :  { %25 = vsyncpa [#allocation7 + $0x1], 0  ;;  %s1058_s26 = smov 0   ;;  %s1060_s27 = smov 0  }
   0x9   :  { %s1062_s0 = smov 0   ;;  %s1064_s28 = smov 0  }
   0xa   :  { %s1066_s1 = smov 0   ;;  %s1068_s29 = smov 0  }
   0xb LB: > { %s745_s30 = sadd.s32 4294967295, %s1011_s29   ;;  %s746_s6 = sadd.s32 4294967294, %s1011_s29   ;;  %s1011_s29 = sphi %s1068_s29, %s31_s29   ;;  %s1007_s1 = sphi %s1066_s1, %s1303_s1   ;;  %s1003_s28 = sphi %s1064_s28, %s1302_s28   ;;  %s999_s0 = sphi %s1062_s0, %s1301_s0   ;;  %s995_s27 = sphi %s1060_s27, %s1300_s27   ;;  %s991_s26 = sphi %s1058_s26, %s1299_s26  }
   0xc   : > { %s43_s7 = sadd.s32 1, %s1007_s1  ;;  %s152_s8 = sadd.s32 1, %s999_s0 }
   0xd   : > { %p45_p0 = scmp.ge.s32.totalorder %s43_s7, 2  ;;  %p162_p1 = scmp.ne.s32.totalorder %s999_s0, %s995_s27 }
   0xe   : > { %p163_p2 = scmp.eq.s32.totalorder %s745_s30, 1  ;;  %p168_p3 = scmp.ne.s32.totalorder %s995_s27, %s991_s26 }
   0xf   : > { %s1305_s7 = smov (%p45_p0, %s43_s7), 0  ;;  %p169_p5 = scmp.eq.s32.totalorder %s746_s6, 1 }
  0x10   : > { %p1098_p4 = por %p163_p2, %p162_p1  ;;  %s149_s10 = ssub.s32 %s1007_s1, %s1305_s7 }
  0x11   : > { %p757_p6 = scmp.ge.s32.totalorder %s1011_s29, 1  ;;  %p150_p7 = scmp.eq.s32.totalorder %s149_s10, 0 }
  0x12   : > { %p1105_p8 = por %p169_p5, %p168_p3  ;;  %p235_p9 = scmp.lt.s32.totalorder %s1011_s29, 3 }
  0x13   : > { %s1111_s12 = scalar_select %p150_p7, %s999_s0, %s152_s8  }
  0x14   : > { %p236_p10 = pnand %p757_p6, %p235_p9 }
  0x15   : > { %s1287_s13 = sand.u32 (!%p236_p10), 1, %s995_s27   ;;  %s280_s15 = sld [smem:[#allocation5 + %s1003_s28]] (!%p236_p10) }
  0x16   : > { %239 = sbr.rel (%p236_p10) target bundleno = 598 (0x256), region = 32  ;;  %s1116_s14 = sshll.u32 (!%p236_p10), %s1287_s13, 5 }
  0x17   : > { %s279_s16 = sld [smem:[#allocation4 + %s1003_s28]] (!%p236_p10)  ;;  %s765_s18 = sshll.u32 (!%p236_p10), %s1003_s28, 2 }
  0x18   : > { %s295_s17 = sld [smem:[#allocation5 + %s1003_s28]] (!%p236_p10)  ;;  %p313_p11 = scmp.lt.s32.totalorder (!%p236_p10), %s765_s18, 7 }
  0x19   : > { %s328_s19 = sld [smem:[#allocation5 + %s1003_s28]] (!%p236_p10) }
  0x1a   : > { %s294_s21 = sld [smem:[#allocation4 + %s1003_s28]] (!%p236_p10) }
  0x1b   : > { %vm323_vm0 = vcmask 64512   ;;  %v1015_v0 = vmov 0.0   ;;  %s1307_s18 = smov (!%p313_p11, %s765_s18), 7  ;;  %s759_s20 = sadd.s32 4294967295, %s280_s15 }
  0x1c   : > { %324 = vst.msk [vmem:[#allocation2] sm:$0xff] %vm323_vm0, %v1015_v0  ;;  %p760_p12 = scmp.gt.s32.totalorder %s759_s20, 0  ;;  %s766_s22 = sshll.u32 %s1307_s18, 3 }
  0x1d   : > { %325 = vst.msk [vmem:[#allocation2 + $0x8] sm:$0xff] %vm323_vm0, %v1015_v0  ;;  %s1131_s30 = scalar_lea.vmem %s1284_s4, %s766_s22 }
  0x1e   : > { %326 = vst.msk [vmem:[#allocation2 + $0x10] sm:$0xff] %vm323_vm0, %v1015_v0  ;;  %s761_s23 = sadd.s32 4294967295, %s295_s17  ;;  %s1309_s20 = smov (%p760_p12, %s759_s20), 0 }
  0x1f   : > { %327 = vst.msk [vmem:[#allocation2 + $0x18] sm:$0xff] %vm323_vm0, %v1015_v0  ;;  %p762_p13 = scmp.gt.s32.totalorder %s761_s23, 0  ;;  %s284_s6 = sadd.s32 %s1309_s20, %s279_s16 }
  0x20   : > { %p285_p0 = scmp.lt.s32.totalorder %s284_s6, 0  ;;  %s1145_s16 = scalar_lea.vmem [#allocation6], %s1116_s14 }
  0x21   : > { %s1311_s23 = smov (%p762_p13, %s761_s23), 0  ;;  %p768_p2 = scmp.le.s32.totalorder %s328_s19, 0 }
  0x22   : > { %s1313_s6 = smov (!%p285_p0, %s284_s6), 0  ;;  %s299_s8 = sadd.s32 %s1311_s23, %s294_s21 }
  0x23   : > { %s287_s18 = scalar_lea.vmem %s1282_s2, %s1313_s6  ;;  %s763_s13 = sshll.u32 %s299_s8, 4 }
  0x24   : > { %p301_p1 = scmp.lt.s32.totalorder %s763_s13, 15  ;;  %332 = sbr.rel (%p768_p2) target bundleno = 211 (0xd3), region = 40 }
  0x26   : > { %s1315_s13 = smov (!%p301_p1, %s763_s13), 15 }
  0x27   : > { %s764_s17 = sshll.u32 %s1315_s13, 2  ;;  %s769_s13 = sshll.u32 (!%p768_p2), %s1003_s28, 5 }
  0x28   : > { %s1142_s25 = scalar_lea.vmem %s1283_s3, %s764_s17 }
  0x29   : > { %v822_v1 = vld [vmem:[%s1142_s25 + $0x38] sm:$0xff]  ;;  %v821_v2 = vld [vmem:[%s1142_s25 + $0x30] sm:$0xff]  ;;  %v820_v3 = vld [vmem:[%s1142_s25 + $0x28] sm:$0xff]  ;;  %v334_v5 = vlaneseq  ;;  %v339_v10 = vstv %s769_s13  ;;  %v1016_v20 = vmov 1.0|1.0  }
  0x2a   : > { %428 = vmatpush.bf16.msra.mxu0 %v822_v1  ;;  %824 = vmatpush.bf16.msra.mxu1 %v822_v1  ;;  %v819_v4 = vld [vmem:[%s1142_s25 + $0x20] sm:$0xff]  ;;  %v818_v6 = vld [vmem:[%s1142_s25 + $0x18] sm:$0xff]  ;;  %v817_v8 = vld [vmem:[%s1142_s25 + $0x10] sm:$0xff] }
  0x2b   : > { %v335_v7 = vshrl.u32 %v334_v5, 7  ;;  %v816_v13 = vld [vmem:[%s1142_s25 + $0x8] sm:$0xff]  ;;  %v896_v16 = vld [vmem:[%s287_s18] ss:$0 sm:$0xff]  ;;  %v362_v22 = vld [vmem:[#allocation2 + $0x10] sm:$0xff] }
  0x2c   : > { %v815_v19 = vld [vmem:[%s1142_s25] sm:$0xff]  ;;  %v361_v27 = vld [vmem:[#allocation2 + $0x8] sm:$0xff]  ;;  %v363_v28 = vld [vmem:[#allocation2 + $0x18] sm:$0xff] }
  0x2d   : > { %v336_v9 = vadd.s32 8, %v335_v7  ;;  %v337_v11 = vadd.s32 16, %v335_v7  ;;  %v338_v12 = vadd.s32 24, %v335_v7  ;;  %v340_v14 = vadd.s32 %v339_v10, %v335_v7  ;;  %v360_v21 = vld [vmem:[#allocation2] sm:$0xff] }
  0x2e   : > { %429 = vmatpush.bf16.msra.mxu0 %v821_v2  ;;  %825 = vmatpush.bf16.msra.mxu1 %v821_v2 }
  0x2f   : > { %v341_v15 = vadd.s32 %v339_v10, %v336_v9  ;;  %v342_v17 = vadd.s32 %v339_v10, %v337_v11  ;;  %v343_v18 = vadd.s32 %v339_v10, %v338_v12  ;;  %vm346_vm1 = vcmp.eq.s32.totalorder %v896_v16, %v340_v14 }
  0x31   : > { %vm347_vm2 = vcmp.eq.s32.totalorder %v896_v16, %v341_v15  ;;  %vm348_vm3 = vcmp.eq.s32.totalorder %v896_v16, %v342_v17  ;;  %vm349_vm4 = vcmp.eq.s32.totalorder %v896_v16, %v343_v18 }
  0x32   : > { %430 = vmatpush.bf16.msra.mxu0 %v820_v3  ;;  %826 = vmatpush.bf16.msra.mxu1 %v820_v3  ;;  %vm806_vm5 = vmpackc.low %vm347_vm2, %vm346_vm1 }
  0x33   : > { %vm808_vm6 = vmpackc.low %vm349_vm4, %vm348_vm3 }
  0x36   : > { %431 = vmatpush.bf16.msra.mxu0 %v819_v4  ;;  %827 = vmatpush.bf16.msra.mxu1 %v819_v4 }
  0x3a   : > { %432 = vmatpush.bf16.msra.mxu0 %v818_v6  ;;  %828 = vmatpush.bf16.msra.mxu1 %v818_v6 }
  0x3e   : > { %433 = vmatpush.bf16.msra.mxu0 %v817_v8  ;;  %829 = vmatpush.bf16.msra.mxu1 %v817_v8 }
  0x42   : > { %434 = vmatpush.bf16.msra.mxu0 %v816_v13  ;;  %830 = vmatpush.bf16.msra.mxu1 %v816_v13 }
  0x46   : > { %435 = vmatpush.bf16.msra.mxu0 %v815_v19  ;;  %831 = vmatpush.bf16.msra.mxu1 %v815_v19 }
  0x49   : > { %807 = vmatmul.msk.bf16.vlgmr.msra.gmra.mxu0 %vm806_vm5, %v1016_v20  ;;  %809 = vmatmul.msk.bf16.vlgmr.msra.gmra.mxu1 %vm808_vm6, %v1016_v20 }
  0xc6   : > { %v437_v23 = vpop.f32.mrf.mxu0  ;;  %v442_v24 = vpop.f32.mrf.mxu1 }
  0xc7   : > { %v447_v25 = vadd.f32 %v437_v23, %v360_v21  ;;  %v449_v26 = vadd.f32 %v442_v24, %v362_v22 }
  0xc9   : > { %452 = vst.msk [vmem:[#allocation2] sm:$0xff] %vm323_vm0, %v447_v25 }
  0xca   : > { %454 = vst.msk [vmem:[#allocation2 + $0x10] sm:$0xff] %vm323_vm0, %v449_v26 }
  0xce   : > { %v439_v29 = vpop.f32.mrf.mxu0  ;;  %v444_v30 = vpop.f32.mrf.mxu1 }
  0xcf   : > { %v448_v31 = vadd.f32 %v439_v29, %v361_v27  ;;  %v450_v32 = vadd.f32 %v444_v30, %v363_v28 }
  0xd1   : > { %453 = vst.msk [vmem:[#allocation2 + $0x8] sm:$0xff] %vm323_vm0, %v448_v31 }
  0xd2   : > { %455 = vst.msk [vmem:[#allocation2 + $0x18] sm:$0xff] %vm323_vm0, %v450_v32 }
  0xd3 PF: > { %v1165_v33 = vld [vmem:[#allocation2 + $0x10] sm:$0xff]  ;;  %v1167_v34 = vld [vmem:[#allocation2] sm:$0xff]  ;;  %v1017_v36 = vmov 0   ;;  %s1018_s20 = smov 3   ;;  %s1019_s21 = smov 125  }
  0xd4   : > { %898 = vset.pattern.permute.xlu1 %v1017_v36  ;;  %897 = vset.pattern.permute.xlu0 %v1017_v36  ;;  %vm465_vm7 = vcmp.gt.f32.partialorder %v1165_v33, 0.0  ;;  %vm463_vm8 = vcmp.gt.f32.partialorder %v1167_v34, 0.0  ;;  %s823_s23 = sshll.u32 %s1003_s28, 5  ;;  %s651_s28 = sshll.u32 %s1145_s16, 4  ;;  %s652_s28 = int_to_ptr.vmem [resolvable:$true] %s651_s28 }
  0xd5   : > { %v469_v38 = vsel %vm465_vm7, %v1165_v33, 1.0  ;;  %v467_v39 = vsel %vm463_vm8, %v1167_v34, 1.0  ;;  %s650_s10 = scalar_lea.hbm %s1285_s5, %s823_s23  ;;  %s951_s13 = scalar_lea.hbm %s1285_s5, 64 }
  0xd6   : > { %899 = vrcp.f32 %v469_v38  ;;  %v508_v43 = vand.u32 2147483647, %v469_v38  ;;  %v510_v46 = vand.u32 2147483648, %v469_v38  ;;  %v480_v49 = vand.u32 2147483647, %v467_v39  ;;  %s653_s15 = sshll.u32 %s650_s10, 4  ;;  %s654_s15 = int_to_ptr.hbm [resolvable:$true] %s653_s15 }
  0xd7   : > { %901 = vrcp.f32 %v467_v39  ;;  %v482_v50 = vand.u32 2147483648, %v467_v39  ;;  %vm504_vm11 = vweird.f32 %v469_v38  ;;  %vm476_vm14 = vweird.f32 %v467_v39  ;;  %s945_s17 = sshra.s32 %s654_s15, 4  ;;  %s946_s17 = int_to_ptr.hbm [resolvable:$true] %s945_s17 }
  0xd8   : > { %v1174_v37 = vld [vmem:[#allocation2 + $0x8] sm:$0xff]  ;;  %vm1181_vm13 = vcmp.eq.f32.partialorder %v508_v43, 8.507059e+37  ;;  %v511_v57 = vor.u32 1.1754944e-38, %v510_v46  ;;  %vm1189_vm2 = vcmp.eq.f32.partialorder %v480_v49, 8.507059e+37  ;;  %s947_s24 = scalar_lea.hbm %s946_s17, 32  ;;  %p952_p7 = scmp.lt.s32.totalorder %s946_s17, %s1285_s5 }
  0xd9   : > { %v1169_v35 = vld [vmem:[#allocation2 + $0x18] sm:$0xff]  ;;  %vm464_vm10 = vcmp.gt.f32.partialorder %v1174_v37, 0.0  ;;  %v483_v62 = vor.u32 1.1754944e-38, %v482_v50  ;;  %v579_v50 = vld [vmem:[%s1131_s30] sm:$0xff]  ;;  %p948_p3 = scmp.ne.s32.totalorder %s946_s17, %s947_s24  ;;  %p953_p9 = scmp.lt.s32.totalorder %s951_s13, %s947_s24 }
  0xda   : > { %vm466_vm9 = vcmp.gt.f32.partialorder %v1169_v35, 0.0  ;;  %v468_v41 = vsel %vm464_vm10, %v1174_v37, 1.0 }
  0xdb   : > { %v470_v40 = vsel %vm466_vm9, %v1169_v35, 1.0  ;;  %vm490_vm5 = vweird.f32 %v468_v41  ;;  %v496_v9 = vand.u32 2147483648, %v468_v41  ;;  %v494_v13 = vand.u32 2147483647, %v468_v41  ;;  %p949_p5 = pnand %p948_p3, %p1098_p4  ;;  %p954_p10 = por %p953_p9, %p952_p7 }
  0xdc   : > { %903 = vrcp.f32 %v470_v40  ;;  %v900_v42 = vpop.eup %899  ;;  %vm518_vm0 = vweird.f32 %v470_v40  ;;  %v524_v3 = vand.u32 2147483648, %v470_v40  ;;  %v522_v8 = vand.u32 2147483647, %v470_v40 }
  0xdd   : > { %905 = vrcp.f32 %v468_v41  ;;  %v902_v44 = vpop.eup %901  ;;  %v500_v45 = vmul.f32 %v900_v42, %v469_v38  ;;  %vm505_vm12 = vweird.f32 %v900_v42  ;;  %v497_v18 = vor.u32 1.1754944e-38, %v496_v9  ;;  %p950_p6 = pneg %p949_p5 }
  0xde   : > { %v472_v48 = vmul.f32 %v902_v44, %v467_v39  ;;  %vm477_vm15 = vweird.f32 %v902_v44  ;;  %vm1185_vm1 = vmor %vm504_vm11, %vm505_vm12  ;;  %v525_v15 = vor.u32 1.1754944e-38, %v524_v3  ;;  %vm523_vm9 = vcmp.eq.f32.partialorder %v522_v8, 8.507059e+37  ;;  %v580_v3 = vld [vmem:[%s1131_s30 + $0x8] sm:$0xff] }
  0xdf   : > { %v501_v51 = vsub.f32 1.0, %v500_v45  ;;  %vm1193_vm3 = vmor %vm476_vm14, %vm477_vm15  ;;  %vm495_vm10 = vcmp.eq.f32.partialorder %v494_v13, 8.507059e+37  ;;  %vm619_vm11 = vcmask 7168   ;;  %vm624_vm12 = vcmask 31744   ;;  %p955_p11 = pnand %p954_p10, %p950_p6 }
  0xe0   : > { %v473_v54 = vsub.f32 1.0, %v472_v48 }
  0xe1   : > { %v502_v56 = vmul.f32 %v900_v42, %v501_v51  ;;  %v583_v51 = vmul.f32 %v579_v50, %v1167_v34 }
  0xe2   : > { %v904_v47 = vpop.eup %903  ;;  %v474_v60 = vmul.f32 %v902_v44, %v473_v54 }
  0xe3   : > { %v514_v52 = vmul.f32 %v904_v47, %v470_v40  ;;  %v906_v55 = vpop.eup %905  ;;  %v503_v0 = vadd.f32 %v900_v42, %v502_v56  ;;  %vm519_vm4 = vweird.f32 %v904_v47 }
  0xe4   : > { %v486_v63 = vmul.f32 %v906_v55, %v468_v41  ;;  %v475_v4 = vadd.f32 %v902_v44, %v474_v60  ;;  %vm491_vm6 = vweird.f32 %v906_v55  ;;  %vm520_vm7 = vmor %vm518_vm0, %vm519_vm4 }
  0xe5   : > { %v515_v58 = vsub.f32 1.0, %v514_v52  ;;  %v507_v6 = vsel %vm1185_vm1, %v900_v42, %v503_v0  ;;  %vm492_vm8 = vmor %vm490_vm5, %vm491_vm6 }
  0xe6   : > { %v487_v5 = vsub.f32 1.0, %v486_v63  ;;  %v512_v10 = vsel %vm1181_vm13, %v511_v57, %v507_v6  ;;  %v479_v11 = vsel %vm1193_vm3, %v902_v44, %v475_v4  ;;  %vm629_vm13 = vcmask 56320   ;;  %v581_v63 = vld [vmem:[%s1131_s30 + $0x10] sm:$0xff] }
  0xe7   : > { %v516_v2 = vmul.f32 %v904_v47, %v515_v58  ;;  %539 = vperm.xlu1 %898, %v512_v10   ;;  %v484_v14 = vsel %vm1189_vm2, %v483_v62, %v479_v11  ;;  %v582_v58 = vld [vmem:[%s1131_s30 + $0x18] sm:$0xff]  ;;  %v585_v1 = vmul.f32 %v581_v63, %v1165_v33  ;;  %s1298_s30 = sand.u32 1, %s995_s27  }
  0xe8   : > { %v488_v12 = vmul.f32 %v906_v55, %v487_v5  ;;  %529 = vperm.xlu0 %897, %v484_v14   ;;  %s639_s18 = scalar_lea.sflag [#allocation7], %s1298_s30 }
  0xe9   : > { %v517_v7 = vadd.f32 %v904_v47, %v516_v2 }
  0xea   : > { %v489_v16 = vadd.f32 %v906_v55, %v488_v12 }
  0xeb   : > { %v521_v17 = vsel %vm520_vm7, %v904_v47, %v517_v7  ;;  %v584_v7 = vmul.f32 %v580_v3, %v1174_v37 }
  0xec   : > { %v493_v19 = vsel %vm492_vm8, %v906_v55, %v489_v16  ;;  %v526_v20 = vsel %vm523_vm9, %v525_v15, %v521_v17 }
  0xed   : > { %v498_v21 = vsel %vm495_vm10, %v497_v18, %v493_v19 }
  0xef   : > { %544 = vperm.xlu1 %898, %v526_v20  }
  0xf0   : > { %534 = vperm.xlu0 %897, %v498_v21  }
 0x159   : > { %v540_v22 = vpop.permute.xlu1 %539 }
 0x15a   : > { %v549_v23 = vmul.f32 %v540_v22, %v1165_v33  ;;  %v530_v24 = vpop.permute.xlu0 %529 }
 0x15b   : > { %v547_v25 = vmul.f32 %v530_v24, %v1167_v34  ;;  %v586_v34 = vmul.f32 %v582_v58, %v1169_v35 }
 0x15c   : > { %v553_v26 = vmul.f32 %v549_v23, %v549_v23 }
 0x15d   : > { %v551_v27 = vmul.f32 %v547_v25, %v547_v25 }
 0x15e   : > { %563 = vrot.lane.b32.xlu0 %v553_v26, %s1018_s20 }
 0x15f   : > { %559 = vrot.lane.b32.xlu2 %v551_v27, %s1018_s20 }
 0x161   : > { %v545_v28 = vpop.permute.xlu1 %544 }
 0x162   : > { %v550_v29 = vmul.f32 %v545_v28, %v1169_v35  ;;  %v535_v30 = vpop.permute.xlu0 %534 }
 0x163   : > { %v548_v31 = vmul.f32 %v535_v30, %v1174_v37 }
 0x164   : > { %v554_v32 = vmul.f32 %v550_v29, %v550_v29 }
 0x165   : > { %v552_v36 = vmul.f32 %v548_v31, %v548_v31 }
 0x166   : > { %565 = vrot.lane.b32.xlu1 %v554_v32, %s1018_s20  ;;  %607 = vrot.lane.b32.xlu0 %v547_v25, %s1018_s20 }
 0x167   : > { %561 = vrot.lane.b32.xlu2 %v552_v36, %s1018_s20 }
 0x1b9   : > { %v560_v38 = vpop.permute.xlu2 %559 }
 0x1ba   : > { %v571_v39 = vsub.f32 %v547_v25, %v560_v38 }
 0x1bc   : > { %v575_v40 = vmax.f32 %v571_v39, 0.0 }
 0x1be   : > { %591 = vrot.lane.b32.xlu2 %v575_v40, %s1019_s21 }
 0x1c1   : > { %v562_v41 = vpop.permute.xlu2 %561 }
 0x1c2   : > { %v572_v42 = vsub.f32 %v548_v31, %v562_v41 }
 0x1c4   : > { %v576_v43 = vmax.f32 %v572_v42, 0.0 }
 0x1c6   : > { %593 = vrot.lane.b32.xlu0 %v576_v43, %s1019_s21 }
 0x1ce   : > { %613 = vrot.lane.b32.xlu0 %v550_v29, %s1018_s20 }
 0x1d0   : > { %v564_v44 = vpop.permute.xlu0 %563 }
 0x1d1   : > { %v573_v45 = vsub.f32 %v549_v23, %v564_v44 }
 0x1d3   : > { %v577_v46 = vmax.f32 %v573_v45, 0.0 }
 0x1d5   : > { %595 = vrot.lane.b32.xlu1 %v577_v46, %s1019_s21 }
 0x1d8   : > { %v566_v47 = vpop.permute.xlu1 %565  ;;  %v608_v53 = vpop.permute.xlu0 %607 }
 0x1d9   : > { %v574_v48 = vsub.f32 %v550_v29, %v566_v47 }
 0x1db   : > { %v578_v49 = vmax.f32 %v574_v48, 0.0 }
 0x1dd   : > { %597 = vrot.lane.b32.xlu2 %v578_v49, %s1019_s21  ;;  %609 = vrot.lane.b32.xlu1 %v548_v31, %s1018_s20 }
 0x1e5   : > { %611 = vrot.lane.b32.xlu2 %v549_v23, %s1018_s20 }
 0x218   : > { %v592_v52 = vpop.permute.xlu2 %591 }
 0x219   : > { %v620_v54 = vsel %vm619_vm11, %v583_v51, %v592_v52 }
 0x21a   : > { %v625_v55 = vsel %vm624_vm12, %v620_v54, %v608_v53 }
 0x21b   : > { %v630_v56 = vsel %vm629_vm13, %v625_v55, 0.0 }
 0x21c   : > { %634 = vst [vmem:[%s1145_s16] sm:$0xff] %v630_v56 }
 0x237   : > { %v598_v59 = vpop.permute.xlu2 %597 }
 0x238   : > { %v594_v57 = vpop.permute.xlu0 %593  ;;  %v623_v60 = vsel %vm619_vm11, %v586_v34, %v598_v59 }
 0x239   : > { %v621_v33 = vsel %vm619_vm11, %v584_v7, %v594_v57 }
 0x23f   : > { %v612_v4 = vpop.permute.xlu2 %611 }
 0x240   : > { %v614_v61 = vpop.permute.xlu0 %613 }
 0x241   : > { %v628_v62 = vsel %vm624_vm12, %v623_v60, %v614_v61 }
 0x242   : > { %v633_v0 = vsel %vm629_vm13, %v628_v62, 0.0 }
 0x243   : > { %637 = vst [vmem:[%s1145_s16 + $0x18] sm:$0xff] %v633_v0 }
 0x247   : > { %v596_v2 = vpop.permute.xlu1 %595 }
 0x248   : > { %v622_v35 = vsel %vm619_vm11, %v585_v1, %v596_v2 }
 0x249   : > { %v627_v5 = vsel %vm624_vm12, %v622_v35, %v612_v4 }
 0x24a   : > { %v632_v6 = vsel %vm629_vm13, %v627_v5, 0.0 }
 0x24b   : > { %636 = vst [vmem:[%s1145_s16 + $0x10] sm:$0xff] %v632_v6 }
 0x24f   : > { %v610_v8 = vpop.permute.xlu1 %609 }
 0x250   : > { %v626_v9 = vsel %vm624_vm12, %v621_v33, %v610_v8 }
 0x251   : > { %v631_v10 = vsel %vm629_vm13, %v626_v9, 0.0 }
 0x252   : > { %635 = vst [vmem:[%s1145_s16 + $0x8] sm:$0xff] %v631_v10 }
 0x253   : > { %958 = shalt.err (!%p955_p11)
}
 0x254   : > { %s1020_s16 = smov 128   ;;  %s1021_s20 = smov 8  }
 0x255   : > { %832 = dma.vmem_to_hbm [thread:$0]  (%p1098_p4), %s652_s28, 512, %s654_s15, %s639_s18, %s1020_s16, %s1020_s16, %s1021_s20  }
 0x256 PF: > { %p838_p12 = scmp.ge.s32.totalorder %s1011_s29, 2  ;;  %s668_s21 = sand.u32 1, %s991_s26  }
 0x257   : > { %s669_s23 = scalar_lea.sflag [#allocation7], %s668_s21 }
 0x258   : > { %p835_p13 = pnand %p838_p12, %p1105_p8 }
 0x25a   : > { %p836_p0 = pneg %p835_p13 }
 0x25c   : > { %986 = dma.done.wait (%p836_p0), %s669_s23, 512  }
 0x25d   : > { %988 = vsyncadd (%p836_p0), %s669_s23, 4294966784  ;;  %s31_s29 = sadd.s32 1, %s1011_s29   ;;  %s1299_s26 = smov %s995_s27 }
 0x25e   : > { %p28_p1 = scmp.ge.s32.totalorder %s31_s29, 4   ;;  %s1300_s27 = smov %s999_s0 }
 0x25f   : > { %s1301_s0 = smov %s1111_s12  ;;  %s1302_s28 = smov %s1007_s1 }
 0x260   : > { %s1303_s1 = smov %s1305_s7  ;;  %30 = sbr.rel (!%p28_p1) target bundleno = 11 (0xb), region = 85 }
 0x265   :  { %675 = vsyncpa [#allocation7], 1 }
 0x266   :  { %677 = vsyncpa [#allocation7 + $0x1], 1 }

</bundles_post_ra>
